<compile_context>
chip_gen: v7x
topology: tpu7x:2x2x1
jax: 0.10.0
libtpu: 0.0.40
codegen_flags: <defaults>
</compile_context>

<pallas_src>
import functools

import numpy as np
import jax
import jax.numpy as jnp
from jax.experimental import pallas as pl
from jax.experimental.pallas import tpu as pltpu

sunrgbd_frq = [0.3829, 0.452448, 0.637584, 0.377464, 0.585595, 0.479574, 0.781544,
               0.982534, 1.017466, 0.624581, 2.589096, 0.980794, 0.92034, 0.667984,
               1.172291, 0.86224, 0.921714, 2.154782, 1.187832, 1.178115, 1.848545,
               1.428922, 2.849658, 0.771605, 1.656668, 4.483506, 2.209922, 1.12028,
               2.790182, 0.706519, 3.994768, 2.220004, 0.972934, 1.481525, 5.342475,
               0.750738, 4.040773]

nyuv2_frq = [0.04636878, 0.10907704, 0.152566, 0.28470833, 0.29572534, 0.42489686,
             0.49606689, 0.49985867, 0.45401091, 0.52183679, 0.50204292, 0.74834397,
             0.6397011, 1.00739467, 0.80728748, 1.01140891, 1.09866549, 1.25703345,
             0.9408835, 1.56565388, 1.19434108, 0.69079067, 1.86669642, 1.908,
             1.80942453, 2.72492965, 3.00060817, 2.47616595, 2.44053651, 3.80659652,
             3.31090131, 3.9340523, 3.53262803, 4.14408881, 3.71099056, 4.61082739,
             4.78020462, 0.44061509, 0.53504894, 0.21667766]


def _ce2d_kernel(x_ref, t_ref, w_ref, loss_ref, cnt_ref, *, n_valid_pixels):
    # x_ref:   (1, C, TP)    logits tile (classes on sublanes, pixels on lanes)
    # t_ref:   (1, 1, TP)    i32 raw targets (0 == ignore; class = target - 1 otherwise)
    # w_ref:   (C, 1)        f32 per-class weights
    # loss_ref, cnt_ref: (1, 1, 1, 1) per-(image, pixel-block) partial sums
    p = pl.program_id(1)

    x = x_ref[0].astype(jnp.float32)          # (C, TP) keep LSE math in f32
    t = t_ref[0]                              # (1, TP) int32
    w = w_ref[...]                            # (C, 1)  f32

    tp = t.shape[-1]
    lane = jax.lax.broadcasted_iota(jnp.int32, (1, tp), 1)
    valid = (p * tp + lane) < n_valid_pixels  # ragged-last-tile pixel validity (1, TP)
    mask = (t > 0) & valid                    # valid AND not-ignore

    # one-hot class select: tiny (C,1) sublane iota broadcast against (1,TP) targets
    cls = jax.lax.broadcasted_iota(jnp.int32, (x.shape[0], 1), 0)    # (C, 1)
    sel = cls == (t - 1)                                             # (C, TP)

    # numerically-stable log-sum-exp over the class (sublane) axis
    m = jnp.max(x, axis=0, keepdims=True)                            # (1, TP)
    lse = m + jnp.log(jnp.sum(jnp.exp(x - m), axis=0, keepdims=True))
    picked = jnp.sum(jnp.where(sel, x, 0.0), axis=0, keepdims=True)  # logit at target
    w_t = jnp.sum(jnp.where(sel, w, 0.0), axis=0, keepdims=True)     # weight at target

    # SELECT (not multiply) so NaN/Inf from garbage lanes of a ragged tile cannot propagate
    loss_px = jnp.where(mask, w_t * (lse - picked), 0.0)             # (1, TP)
    cnt_px = mask.astype(jnp.float32)                                # (1, TP)

    loss_ref[0, 0, :, :] = jnp.sum(loss_px, keepdims=True)           # (1,1)
    cnt_ref[0, 0, :, :] = jnp.sum(cnt_px, keepdims=True)             # (1,1)


def _pick_pixel_tile(hw, max_tile):
    """Pick a lane-aligned pixel tile. Prefer a 128-multiple divisor of HW (no ragged
    tile); otherwise fall back to max_tile with in-kernel masking of the last tile."""
    if hw <= max_tile:
        return hw                              # full extent is always a legal block dim
    assert max_tile % 128 == 0
    for k in range(max_tile // 128, max_tile // 256, -1):   # only accept >= max_tile/2
        t = k * 128
        if hw % t == 0:
            return t
    return max_tile


def cross_entropy_loss_2d_u(logits_nchw, targets_nhw, weight, max_tile=16384):
    """Forward pass of CrossEntropyLoss2d_u.

    logits_nchw: (N, C, H, W) float logits (f32 or bf16)
    targets_nhw: (N, H, W) int targets; 0 means "ignore", class = target - 1
    weight: (C,) per-class weights
    Returns a scalar: sum(masked weighted per-pixel CE) / sum(mask).
    (If every target is 0 this divides by zero -> NaN, same as the PyTorch module.)
    """
    N, C, H, W = logits_nchw.shape
    HW = H * W

    # NCHW is consumed directly: (N, C, H, W) -> (N, C, H*W) is a free reshape.
    x = logits_nchw.reshape(N, C, HW)
    t = targets_nhw.reshape(N, 1, HW).astype(jnp.int32)
    w = jnp.asarray(weight, jnp.float32).reshape(C, 1)

    tp = _pick_pixel_tile(HW, max_tile)
    n_p = pl.cdiv(HW, tp)

    kernel = functools.partial(_ce2d_kernel, n_valid_pixels=HW)

    # Per-(image, pixel-block) partial sums; trailing (1,1) dims keep the output block's
    # last two dims equal to the full array extents (legal tiling for scalar-per-step).
    loss_p, cnt_p = pl.pallas_call(
        kernel,
        out_shape=(jax.ShapeDtypeStruct((N, n_p, 1, 1), jnp.float32),
                   jax.ShapeDtypeStruct((N, n_p, 1, 1), jnp.float32)),
        grid_spec=pltpu.PrefetchScalarGridSpec(
            num_scalar_prefetch=0,
            grid=(N, n_p),
            in_specs=[
                pl.BlockSpec((1, C, tp), lambda n, p: (n, 0, p)),
                pl.BlockSpec((1, 1, tp), lambda n, p: (n, 0, p)),
                pl.BlockSpec((C, 1), lambda n, p: (0, 0)),
            ],
            out_specs=[
                pl.BlockSpec((1, 1, 1, 1), lambda n, p: (n, p, 0, 0)),
                pl.BlockSpec((1, 1, 1, 1), lambda n, p: (n, p, 0, 0)),
            ],
        ),
        compiler_params=pltpu.CompilerParams(
            dimension_semantics=("parallel", "parallel"),
            vmem_limit_bytes=32 * 1024 * 1024,
        ),
    )(x, t, w)

    return jnp.sum(loss_p) / jnp.sum(cnt_p)


def _reference(logits_nchw, targets_nhw, weight):
    # pure-JAX reference of the PyTorch forward, for sanity checking
    mask = targets_nhw > 0
    tm = jnp.where(mask, targets_nhw - 1, targets_nhw)
    logp = jax.nn.log_softmax(logits_nchw.astype(jnp.float32), axis=1)
    picked = jnp.take_along_axis(logp, tm[:, None, :, :], axis=1)[:, 0]
    w_t = jnp.asarray(weight, jnp.float32)[tm]
    loss_all = -w_t * picked
    return jnp.sum(jnp.where(mask, loss_all, 0.0)) / jnp.sum(mask.astype(jnp.float32))


if __name__ == "__main__":
    key = jax.random.PRNGKey(0)
    k1, k2, k3, k4, k5, k6 = jax.random.split(key, 6)

    weight = jnp.asarray(np.array(sunrgbd_frq), jnp.float32)   # SUNRGBD mode -> 37 classes

    # Test 1: small image, single pixel block per image.
    N, C, H, W = 2, 37, 16, 16
    logits = jax.random.normal(k1, (N, C, H, W), dtype=jnp.float32)
    targets = jax.random.randint(k2, (N, H, W), 0, C + 1, dtype=jnp.int32)

    out = cross_entropy_loss_2d_u(logits, targets, weight)
    out = jax.block_until_ready(out)
    ref = _reference(logits, targets, weight)
    np.testing.assert_allclose(np.asarray(out), np.asarray(ref), rtol=1e-5, atol=1e-5)

    # Test 2: force multiple pixel blocks with a ragged last tile (273 = 2*128 + 17)
    # to exercise the in-kernel boundary-select path (no host-side padding).
    H2, W2 = 13, 21
    logits2 = jax.random.normal(k3, (N, C, H2, W2), dtype=jnp.float32)
    targets2 = jax.random.randint(k4, (N, H2, W2), 0, C + 1, dtype=jnp.int32)

    out2 = cross_entropy_loss_2d_u(logits2, targets2, weight, max_tile=128)
    out2 = jax.block_until_ready(out2)
    ref2 = _reference(logits2, targets2, weight)
    np.testing.assert_allclose(np.asarray(out2), np.asarray(ref2), rtol=1e-5, atol=1e-5)

    # Test 3: multiple evenly-dividing pixel blocks (divisor-tile path, no ragged tile),
    # bf16 logits to exercise the in-kernel upcast.
    H3, W3 = 16, 32   # HW = 512, max_tile=256 -> tp=256, n_p=2
    logits3 = jax.random.normal(k5, (N, C, H3, W3), dtype=jnp.float32).astype(jnp.bfloat16)
    targets3 = jax.random.randint(k6, (N, H3, W3), 0, C + 1, dtype=jnp.int32)

    out3 = cross_entropy_loss_2d_u(logits3, targets3, weight, max_tile=256)
    out3 = jax.block_until_ready(out3)
    ref3 = _reference(logits3, targets3, weight)
    np.testing.assert_allclose(np.asarray(out3), np.asarray(ref3), rtol=2e-2, atol=2e-2)

    print("KERNEL_OK")
</pallas_src>

<mosaic_0001>
module attributes {stable_mosaic.version = 11 : i64} {
  func.func @_ce2d_kernel(%arg0: i32, %arg1: i32, %arg2: memref<1x37x256xf32, #tpu.memory_space<vmem>>, %arg3: memref<1x1x256xi32, #tpu.memory_space<vmem>>, %arg4: memref<37x1xf32, #tpu.memory_space<vmem>>, %arg5: memref<1x1x1x1xf32, #tpu.memory_space<vmem>>, %arg6: memref<1x1x1x1xf32, #tpu.memory_space<vmem>>) attributes {dimension_semantics = [#tpu.dimension_semantics<parallel>, #tpu.dimension_semantics<parallel>], iteration_bounds = array<i64: 2, 1>, scalar_prefetch = 0 : i64, scratch_operands = 0 : i64, tpu.core_type = #tpu.core_type<tc>, window_params = [{transform_indices = @transform_0, window_bounds = array<i64: 1, 37, 256>}, {transform_indices = @transform_1, window_bounds = array<i64: 1, 1, 256>}, {pipeline_mode = #tpu.pipeline_mode<synchronous>, transform_indices = @transform_2, window_bounds = array<i64: 37, 1>}, {transform_indices = @transform_3, window_bounds = array<i64: 1, 1, 1, 1>}, {transform_indices = @transform_4, window_bounds = array<i64: 1, 1, 1, 1>}]} {
    %c0 = arith.constant 0 : index
    %c0_0 = arith.constant 0 : index
    %c0_1 = arith.constant 0 : index
    %0 = vector.load %arg2[%c0, %c0_0, %c0_1] : memref<1x37x256xf32, #tpu.memory_space<vmem>>, vector<1x37x256xf32>
    %1 = vector.shape_cast %0 : vector<1x37x256xf32> to vector<37x256xf32>
    %c0_2 = arith.constant 0 : index
    %c0_3 = arith.constant 0 : index
    %c0_4 = arith.constant 0 : index
    %2 = vector.load %arg3[%c0_2, %c0_3, %c0_4] : memref<1x1x256xi32, #tpu.memory_space<vmem>>, vector<1x1x256xi32>
    %3 = vector.shape_cast %2 : vector<1x1x256xi32> to vector<1x256xi32>
    %c0_5 = arith.constant 0 : index
    %c0_6 = arith.constant 0 : index
    %4 = vector.load %arg4[%c0_5, %c0_6] : memref<37x1xf32, #tpu.memory_space<vmem>>, vector<37x1xf32>
    %5 = tpu.iota {dimensions = array<i32: 1>} : vector<1x256xi32>
    %c256_i32 = arith.constant 256 : i32
    %6 = arith.muli %arg1, %c256_i32 : i32
    %7 = vector.broadcast %6 : i32 to vector<1x256xi32>
    %8 = arith.addi %7, %5 : vector<1x256xi32>
    %c256_i32_7 = arith.constant 256 : i32
    %9 = vector.broadcast %c256_i32_7 : i32 to vector<1x256xi32>
    %10 = arith.cmpi slt, %8, %9 : vector<1x256xi32>
    %c0_i32 = arith.constant 0 : i32
    %11 = vector.broadcast %c0_i32 : i32 to vector<1x256xi32>
    %12 = arith.cmpi sgt, %3, %11 : vector<1x256xi32>
    %13 = arith.andi %12, %10 : vector<1x256xi1>
    %14 = tpu.iota {dimensions = array<i32: 0>} : vector<37x1xi32>
    %c1_i32 = arith.constant 1 : i32
    %15 = vector.broadcast %c1_i32 : i32 to vector<1x256xi32>
    %16 = arith.subi %3, %15 : vector<1x256xi32>
    %17 = vector.broadcast %14 : vector<37x1xi32> to vector<37x256xi32>
    %18 = vector.broadcast %16 : vector<1x256xi32> to vector<37x256xi32>
    %19 = arith.cmpi eq, %17, %18 : vector<37x256xi32>
    %cst = arith.constant dense<0xFF800000> : vector<256xf32>
    %20 = vector.multi_reduction <maximumf>, %1, %cst [0] : vector<37x256xf32> to vector<256xf32>
    %21 = vector.shape_cast %20 : vector<256xf32> to vector<1x256xf32>
    %22 = vector.broadcast %21 : vector<1x256xf32> to vector<37x256xf32>
    %23 = arith.subf %1, %22 : vector<37x256xf32>
    %24 = math.exp %23 : vector<37x256xf32>
    %cst_8 = arith.constant dense<0.000000e+00> : vector<256xf32>
    %25 = vector.multi_reduction <add>, %24, %cst_8 [0] : vector<37x256xf32> to vector<256xf32>
    %26 = vector.shape_cast %25 : vector<256xf32> to vector<1x256xf32>
    %27 = math.log %26 : vector<1x256xf32>
    %28 = arith.addf %21, %27 : vector<1x256xf32>
    %cst_9 = arith.constant 0.000000e+00 : f32
    %29 = vector.broadcast %cst_9 : f32 to vector<37x256xf32>
    %30 = arith.select %19, %1, %29 : vector<37x256xi1>, vector<37x256xf32>
    %cst_10 = arith.constant dense<0.000000e+00> : vector<256xf32>
    %31 = vector.multi_reduction <add>, %30, %cst_10 [0] : vector<37x256xf32> to vector<256xf32>
    %32 = vector.shape_cast %31 : vector<256xf32> to vector<1x256xf32>
    %cst_11 = arith.constant 0.000000e+00 : f32
    %33 = vector.shape_cast %4 : vector<37x1xf32> to vector<37x1xf32>
    %34 = vector.broadcast %33 : vector<37x1xf32> to vector<37x256xf32>
    %35 = vector.broadcast %cst_11 : f32 to vector<37x256xf32>
    %36 = arith.select %19, %34, %35 : vector<37x256xi1>, vector<37x256xf32>
    %cst_12 = arith.constant dense<0.000000e+00> : vector<256xf32>
    %37 = vector.multi_reduction <add>, %36, %cst_12 [0] : vector<37x256xf32> to vector<256xf32>
    %38 = vector.shape_cast %37 : vector<256xf32> to vector<1x256xf32>
    %39 = arith.subf %28, %32 : vector<1x256xf32>
    %40 = arith.mulf %38, %39 : vector<1x256xf32>
    %cst_13 = arith.constant 0.000000e+00 : f32
    %41 = vector.broadcast %cst_13 : f32 to vector<1x256xf32>
    %42 = arith.select %13, %40, %41 : vector<1x256xi1>, vector<1x256xf32>
    %43 = arith.extui %13 : vector<1x256xi1> to vector<1x256xi32>
    %44 = arith.sitofp %43 : vector<1x256xi32> to vector<1x256xf32>
    %45 = vector.shape_cast %42 : vector<1x256xf32> to vector<1x1x256xf32>
    %cst_14 = arith.constant dense<0.000000e+00> : vector<1xf32>
    %46 = vector.multi_reduction <add>, %45, %cst_14 [1, 2] : vector<1x1x256xf32> to vector<1xf32>
    %47 = vector.shape_cast %46 : vector<1xf32> to vector<1x1x1xf32>
    %48 = vector.extract %47[0, 0, 0] : f32 from vector<1x1x1xf32>
    %49 = vector.broadcast %48 : f32 to vector<1x1xf32>
    %c0_15 = arith.constant 0 : index
    %c0_16 = arith.constant 0 : index
    %c0_17 = arith.constant 0 : index
    %c0_18 = arith.constant 0 : index
    %50 = vector.load %arg5[%c0_15, %c0_16, %c0_17, %c0_18] : memref<1x1x1x1xf32, #tpu.memory_space<vmem>>, vector<1x1x1x1xf32>
    %51 = vector.shape_cast %50 : vector<1x1x1x1xf32> to vector<1x1xf32>
    %52 = vector.shape_cast %49 : vector<1x1xf32> to vector<1x1x1x1xf32>
    tpu.vector_store %arg5[%c0_15, %c0_16, %c0_17, %c0_18], %52 {strides = array<i32>} : memref<1x1x1x1xf32, #tpu.memory_space<vmem>>, vector<1x1x1x1xf32>,
    %53 = vector.shape_cast %44 : vector<1x256xf32> to vector<1x1x256xf32>
    %cst_19 = arith.constant dense<0.000000e+00> : vector<1xf32>
    %54 = vector.multi_reduction <add>, %53, %cst_19 [1, 2] : vector<1x1x256xf32> to vector<1xf32>
    %55 = vector.shape_cast %54 : vector<1xf32> to vector<1x1x1xf32>
    %56 = vector.extract %55[0, 0, 0] : f32 from vector<1x1x1xf32>
    %57 = vector.broadcast %56 : f32 to vector<1x1xf32>
    %c0_20 = arith.constant 0 : index
    %c0_21 = arith.constant 0 : index
    %c0_22 = arith.constant 0 : index
    %c0_23 = arith.constant 0 : index
    %58 = vector.load %arg6[%c0_20, %c0_21, %c0_22, %c0_23] : memref<1x1x1x1xf32, #tpu.memory_space<vmem>>, vector<1x1x1x1xf32>
    %59 = vector.shape_cast %58 : vector<1x1x1x1xf32> to vector<1x1xf32>
    %60 = vector.shape_cast %57 : vector<1x1xf32> to vector<1x1x1x1xf32>
    tpu.vector_store %arg6[%c0_20, %c0_21, %c0_22, %c0_23], %60 {strides = array<i32>} : memref<1x1x1x1xf32, #tpu.memory_space<vmem>>, vector<1x1x1x1xf32>,
    return
  }
  func.func @transform_0(%arg0: i32, %arg1: i32) -> (i32, i32, i32) {
    %c0_i32 = arith.constant 0 : i32
    %c0_i32_0 = arith.constant 0 : i32
    return %arg0, %c0_i32, %arg1 : i32, i32, i32
  }
  func.func @transform_1(%arg0: i32, %arg1: i32) -> (i32, i32, i32) {
    %c0_i32 = arith.constant 0 : i32
    %c0_i32_0 = arith.constant 0 : i32
    return %arg0, %c0_i32, %arg1 : i32, i32, i32
  }
  func.func @transform_2(%arg0: i32, %arg1: i32) -> (i32, i32) {
    %c0_i32 = arith.constant 0 : i32
    %c0_i32_0 = arith.constant 0 : i32
    %c0_i32_1 = arith.constant 0 : i32
    return %c0_i32, %c0_i32_0 : i32, i32
  }
  func.func @transform_3(%arg0: i32, %arg1: i32) -> (i32, i32, i32, i32) {
    %c0_i32 = arith.constant 0 : i32
    %c0_i32_0 = arith.constant 0 : i32
    %c0_i32_1 = arith.constant 0 : i32
    return %arg0, %arg1, %c0_i32, %c0_i32_0 : i32, i32, i32, i32
  }
  func.func @transform_4(%arg0: i32, %arg1: i32) -> (i32, i32, i32, i32) {
    %c0_i32 = arith.constant 0 : i32
    %c0_i32_0 = arith.constant 0 : i32
    %c0_i32_1 = arith.constant 0 : i32
    return %arg0, %arg1, %c0_i32, %c0_i32_0 : i32, i32, i32, i32
  }
}

</mosaic_0001>

<bundles_post_ra>
// kernel: tpu_custom_call.1
= control target key start
LH: loop header
LB: loop body
LE: loop exit
PB: predicated region body
PF: predicated region fallthrough
CT: control target
= control target key end

     0   :  { %s841_s15 = smov 0   ;;  %s843_s16 = smov 0   ;;  %s1128_s0 = inlined_call_operand.vmem [shape: f32[2,37,256], index: 0, kind: input, shape index: {}]   ;;  %s1129_s1 = inlined_call_operand.vmem [shape: s32[2,1,256], index: 1, kind: input, shape index: {}]   ;;  %s1130_s2 = inlined_call_operand.vmem [shape: f32[37,1], index: 2, kind: input, shape index: {}]   ;;  %s1131_s3 = inlined_call_operand.vmem [shape: f32[2,1,1,1], index: 3, kind: output, shape index: {0}]   ;;  %s1132_s4 = inlined_call_operand.vmem [shape: f32[2,1,1,1], index: 4, kind: output, shape index: {1}]  }
   0x1   :  { %s845_s17 = smov 0  }
   0x2 LB: > { %s27_s18 = sadd.s32 1, %s806_s16  ;;  %p722_p0 = scmp.ge.s32.totalorder %s810_s17, 1  ;;  %s810_s17 = sphi %s845_s17, %s15_s17   ;;  %s806_s16 = sphi %s843_s16, %s1136_s16   ;;  %s802_s15 = sphi %s841_s15, %s1135_s15  }
   0x3   : > { %p29_p1 = scmp.ge.s32.totalorder %s27_s18, 2  ;;  %p204_p2 = scmp.lt.s32.totalorder %s810_s17, 3 }
   0x5   : > { %s1138_s18 = smov (%p29_p1, %s27_s18), 0  ;;  %p205_p3 = pnand %p722_p0, %p204_p2 }
   0x6   : > { %v293_v0 = vld [vmem:[%s1130_s2 + $0x10] sm:$0xff] (!%p205_p3)  ;;  %v291_v1 = vld [vmem:[%s1130_s2] sm:$0xff] (!%p205_p3)  ;;  %v312_v2 = vlaneseq (!%p205_p3)  ;;  %p250_p4 = scmp.lt.s32.totalorder (!%p205_p3), %s802_s15, 1  ;;  %v812_v3 = vmov (!%p205_p3), 0   ;;  %v294_v5 = vld [vmem:[%s1130_s2 + $0x18] sm:$0xff] (!%p205_p3)  ;;  %vm352_vm10 = vcmask (!%p205_p3), 1044480  }
   0x7   : > { %208 = sbr.rel (%p205_p3) target bundleno = 382 (0x17e), region = 32  ;;  %763 = vset.pattern.permute.xlu1 (!%p205_p3), %v812_v3  ;;  %762 = vset.pattern.permute.xlu0 (!%p205_p3), %v812_v3  ;;  %v292_v6 = vld [vmem:[%s1130_s2 + $0x8] sm:$0xff] (!%p205_p3)  ;;  %v295_v10 = vld [vmem:[%s1130_s2 + $0x20] sm:$0x1f] (!%p205_p3)  ;;  %v813_v46 = vmov (!%p205_p3), 1966171168  }
   0x8   : > { %475 = vperm.xlu1 (!%p205_p3), %763, %v293_v0   ;;  %465 = vperm.xlu0 (!%p205_p3), %762, %v291_v1   ;;  %v865_v4 = vshrl.u32 (!%p205_p3), %v312_v2, 7  ;;  %v310_v47 = vunpack.c.l.s4 (!%p205_p3), %v813_v46  ;;  %v814_v50 = vmov (!%p205_p3), 1   ;;  %v815_v2 = vmov (!%p205_p3), 0.0  }
   0x9   : > { %v308_v51 = vcombine.low (!%p205_p3), %v814_v50, %v814_v50  ;;  %vm556_vm14 = vcmask (!%p205_p3), 1040384   ;;  %vm570_vm15 = vcmask (!%p205_p3), 0  }
   0xa   : > { %v878_v7 = vsub.s32 (!%p205_p3), 0, %v865_v4  ;;  %v881_v8 = vsub.s32 (!%p205_p3), 1, %v865_v4  ;;  %v892_v11 = vadd.s32 (!%p205_p3), 16, %v865_v4  ;;  %v907_v15 = vadd.s32 (!%p205_p3), 24, %v865_v4 }
   0xb   : > { %v910_v16 = vadd.s32 (!%p205_p3), 8, %v865_v4  ;;  %v913_v17 = vadd.s32 (!%p205_p3), 32, %v865_v4  ;;  %v311_v52 = vunpack.c.0.s8 (!%p205_p3), %v310_v47 }
   0xc   : > { %480 = vperm.xlu1 (!%p205_p3), %763, %v294_v5   ;;  %470 = vperm.xlu0 (!%p205_p3), %762, %v292_v6  }
   0xd   : > { %v1012_v53 = vsub.s32 (!%p205_p3), %v311_v52, %v865_v4 }
   0xe   : > { %s1140_s15 = smov (!%p250_p4, %s802_s15), 1 }
   0xf   : > { %s729_s27 = smul.u32 80, %s1140_s15  ;;  %s724_s28 = sshll.u32 %s1140_s15, 1  ;;  %v315_v54 = vrot.slane %v308_v51, %v1012_v53 }
  0x10   : > { %s266_s5 = scalar_lea.vmem %s1129_s1, %s724_s28  ;;  %485 = vperm.xlu0 %762, %v295_v10   ;;  %s273_s13 = scalar_lea.vmem %s1131_s3, %s1140_s15 }
  0x11   : > { %v886_v9 = vld [vmem:[%s266_s5] sm:$0x3]  ;;  %s898_s10 = scalar_lea.vmem %s1128_s0, %s729_s27  ;;  %v322_v55 = vrot.slane %v315_v54, %v1012_v53  ;;  %s279_s21 = scalar_lea.vmem %s1132_s4, %s1140_s15 }
  0x12   : > { %v725_v12 = vadd.s32 4294967295, %v886_v9  ;;  %v920_v18 = vld [vmem:[%s898_s10] sm:$0xff]  ;;  %v923_v19 = vld [vmem:[%s898_s10 + $0x8] sm:$0xff]  ;;  %v948_v24 = vld [vmem:[%s898_s10 + $0x10] sm:$0xff]  ;;  %vm305_vm11 = vcmp.gt.s32.totalorder %v886_v9, 0 }
  0x13   : > { %v930_v20 = vld [vmem:[%s898_s10 + $0x20] sm:$0xff]  ;;  %v941_v23 = vld [vmem:[%s898_s10 + $0x28] sm:$0xff]  ;;  %v951_v25 = vld [vmem:[%s898_s10 + $0x18] sm:$0xff]  ;;  %vm323_vm12 = vcmp.ne.s32.totalorder %v322_v55, 0 }
  0x14   : > { %v901_v13 = vrot.slane %v725_v12, %v878_v7  ;;  %v904_v14 = vrot.slane %v725_v12, %v881_v8  ;;  %v966_v28 = vld [vmem:[%s898_s10 + $0x30] sm:$0xff]  ;;  %v977_v31 = vld [vmem:[%s898_s10 + $0x38] sm:$0xff]  ;;  %v980_v34 = vld [vmem:[%s898_s10 + $0x40] sm:$0x1f]  ;;  %v350_v56 = vmax.f32 %v920_v18, %v930_v20  ;;  %v362_v57 = vmax.f32 %v923_v19, %v941_v23 }
  0x15   : > { %v983_v35 = vld [vmem:[%s898_s10 + $0x48] sm:$0x1f]  ;;  %v353_v58 = vsel %vm352_vm10, %v980_v34, -inf  ;;  %v351_v60 = vmax.f32 %v948_v24, %v966_v28  ;;  %v363_v62 = vmax.f32 %v951_v25, %v977_v31  ;;  %vm1029_vm13 = vmand %vm305_vm11, %vm323_vm12 }
  0x16   : > { %vm344_vm0 = vcmp.eq.s32.totalorder %v892_v11, %v901_v13  ;;  %vm345_vm1 = vcmp.eq.s32.totalorder %v892_v11, %v904_v14  ;;  %vm340_vm2 = vcmp.eq.s32.totalorder %v865_v4, %v901_v13  ;;  %vm341_vm3 = vcmp.eq.s32.totalorder %v865_v4, %v904_v14 }
  0x17   : > { %v431_v21 = vsel %vm340_vm2, %v920_v18, 0.0  ;;  %v432_v22 = vsel %vm341_vm3, %v923_v19, 0.0  ;;  %vm346_vm4 = vcmp.eq.s32.totalorder %v907_v15, %v901_v13  ;;  %vm347_vm5 = vcmp.eq.s32.totalorder %v907_v15, %v904_v14 }
  0x18   : > { %vm342_vm6 = vcmp.eq.s32.totalorder %v910_v16, %v901_v13  ;;  %vm343_vm7 = vcmp.eq.s32.totalorder %v910_v16, %v904_v14  ;;  %v435_v26 = vsel %vm344_vm0, %v930_v20, 0.0  ;;  %v436_v27 = vsel %vm345_vm1, %v941_v23, 0.0 }
  0x19   : > { %v433_v29 = vsel %vm342_vm6, %v948_v24, 0.0  ;;  %v434_v30 = vsel %vm343_vm7, %v951_v25, 0.0  ;;  %vm348_vm8 = vcmp.eq.s32.totalorder %v913_v17, %v901_v13  ;;  %vm349_vm9 = vcmp.eq.s32.totalorder %v913_v17, %v904_v14 }
  0x1a   : > { %v441_v32 = vadd.f32 %v433_v29, %v431_v21  ;;  %v452_v33 = vadd.f32 %v434_v30, %v432_v22  ;;  %v437_v36 = vsel %vm346_vm4, %v966_v28, 0.0  ;;  %v438_v37 = vsel %vm347_vm5, %v977_v31, 0.0 }
  0x1b   : > { %v439_v38 = vsel %vm348_vm8, %v980_v34, 0.0  ;;  %v440_v39 = vsel %vm349_vm9, %v983_v35, 0.0  ;;  %v364_v59 = vsel %vm352_vm10, %v983_v35, -inf  ;;  %v354_v61 = vmax.f32 %v350_v56, %v353_v58 }
  0x1c   : > { %v442_v40 = vadd.f32 %v441_v32, %v435_v26  ;;  %v453_v41 = vadd.f32 %v452_v33, %v436_v27  ;;  %v444_v42 = vsel %vm352_vm10, %v439_v38, 0.0  ;;  %v455_v43 = vsel %vm352_vm10, %v440_v39, 0.0 }
  0x1d   : > { %v365_v63 = vmax.f32 %v362_v57, %v364_v59  ;;  %v355_v1 = vmax.f32 %v354_v61, %v351_v60  ;;  %v726_v3 = vsel %vm1029_vm13, 1.0, %v815_v2 }
  0x1e   : > { %v443_v44 = vadd.f32 %v442_v40, %v437_v36  ;;  %v454_v45 = vadd.f32 %v453_v41, %v438_v37  ;;  %v576_v6 = vrot.slane %v726_v3, %v878_v7  ;;  %v580_v9 = vrot.slane %v726_v3, %v881_v8 }
  0x1f   : > { %v366_v5 = vmax.f32 %v365_v63, %v363_v62  ;;  %v356_v21 = vrot.slane %v355_v1, 4 }
  0x20   : > { %v1007_v48 = vadd.f32 %v444_v42, %v443_v44  ;;  %v1009_v49 = vadd.f32 %v455_v43, %v454_v45  ;;  %v583_v10 = vsel %vm556_vm14, %v576_v6, 0.0  ;;  %v584_v12 = vsel %vm556_vm14, %v580_v9, 0.0 }
  0x21   : > { %v585_v22 = vadd.f32 %v584_v12, %v583_v10  ;;  %v367_v26 = vrot.slane %v366_v5, 4  ;;  %v357_v27 = vmax.f32 %v355_v1, %v356_v21 }
  0x23   : > { %v368_v29 = vmax.f32 %v366_v5, %v367_v26  ;;  %v358_v30 = vrot.slane %v357_v27, 2 }
  0x25   : > { %v369_v32 = vrot.slane %v368_v29, 2  ;;  %v359_v33 = vmax.f32 %v357_v27, %v358_v30 }
  0x27   : > { %v370_v36 = vmax.f32 %v368_v29, %v369_v32  ;;  %v360_v37 = vrot.slane %v359_v33, 1 }
  0x29   : > { %v371_v38 = vrot.slane %v370_v36, 1  ;;  %v1039_v39 = vmax.f32 %v359_v33, %v360_v37 }
  0x2b   : > { %v1041_v40 = vmax.f32 %v370_v36, %v371_v38  ;;  %v373_v41 = vsub.f32 %v920_v18, %v1039_v39  ;;  %v375_v43 = vsub.f32 %v948_v24, %v1039_v39  ;;  %v377_v47 = vsub.f32 %v930_v20, %v1039_v39 }
  0x2c   : > { %v379_v18 = vsub.f32 %v966_v28, %v1039_v39 }
  0x2d   : > { %v374_v42 = vsub.f32 %v923_v19, %v1041_v40  ;;  %v376_v44 = vsub.f32 %v951_v25, %v1041_v40  ;;  %v383_v45 = vmul.f32 1.442695, %v373_v41  ;;  %v387_v50 = vmul.f32 1.442695, %v375_v43 }
  0x2e   : > { %v378_v51 = vsub.f32 %v941_v23, %v1041_v40  ;;  %v380_v19 = vsub.f32 %v977_v31, %v1041_v40  ;;  %v391_v24 = vmul.f32 1.442695, %v377_v47  ;;  %v381_v25 = vsub.f32 %v980_v34, %v1039_v39 }
  0x2f   : > { %586 = vadd.xlane.f32.xlu0 %v585_v22  ;;  %v385_v46 = vmul.f32 1.442695, %v374_v42  ;;  %v389_v52 = vmul.f32 1.442695, %v376_v44  ;;  %764 = vpow2.f32 %v383_v45  ;;  %v382_v54 = vsub.f32 %v983_v35, %v1041_v40 }
  0x30   : > { %v393_v20 = vmul.f32 1.442695, %v378_v51  ;;  %v395_v23 = vmul.f32 1.442695, %v379_v18  ;;  %v397_v55 = vmul.f32 1.442695, %v380_v19 }
  0x31   : > { %766 = vpow2.f32 %v385_v46  ;;  %v399_v56 = vmul.f32 1.442695, %v381_v25  ;;  %v401_v28 = vmul.f32 1.442695, %v382_v54  ;;  %v446_v43 = vrot.slane %v1007_v48, 4 }
  0x32   : > { %768 = vpow2.f32 %v387_v50  ;;  %v457_v44 = vrot.slane %v1009_v49, 4 }
  0x33   : > { %770 = vpow2.f32 %v389_v52  ;;  %v447_v50 = vadd.f32 %v446_v43, %v1007_v48 }
  0x34   : > { %772 = vpow2.f32 %v391_v24  ;;  %v458_v51 = vadd.f32 %v457_v44, %v1009_v49 }
  0x35   : > { %774 = vpow2.f32 %v393_v20  ;;  %v448_v18 = vrot.slane %v447_v50, 2 }
  0x36   : > { %776 = vpow2.f32 %v395_v23  ;;  %v459_v19 = vrot.slane %v458_v51, 2 }
  0x37   : > { %778 = vpow2.f32 %v397_v55 }
  0x38   : > { %780 = vpow2.f32 %v399_v56 }
  0x39   : > { %v765_v57 = vpop.eup %764  ;;  %782 = vpow2.f32 %v401_v28 }
  0x3b   : > { %v767_v31 = vpop.eup %766 }
  0x3c   : > { %v769_v58 = vpop.eup %768 }
  0x3d   : > { %v771_v59 = vpop.eup %770  ;;  %v403_v34 = vadd.f32 %v769_v58, %v765_v57  ;;  %v460_v58 = vadd.f32 %v459_v19, %v458_v51 }
  0x3e   : > { %v773_v60 = vpop.eup %772  ;;  %v414_v61 = vadd.f32 %v771_v59, %v767_v31  ;;  %v449_v31 = vadd.f32 %v448_v18, %v447_v50 }
  0x3f   : > { %v775_v62 = vpop.eup %774  ;;  %v404_v35 = vadd.f32 %v773_v60, %v403_v34 }
  0x40   : > { %v777_v63 = vpop.eup %776  ;;  %v415_v2 = vadd.f32 %v775_v62, %v414_v61  ;;  %v450_v15 = vrot.slane %v449_v31, 1 }
  0x41   : > { %v779_v1 = vpop.eup %778  ;;  %v405_v6 = vadd.f32 %v777_v63, %v404_v35 }
  0x42   : > { %v781_v3 = vpop.eup %780  ;;  %v416_v10 = vadd.f32 %v779_v1, %v415_v2  ;;  %v451_v14 = vadd.f32 %v450_v15, %v449_v31 }
  0x43   : > { %v783_v5 = vpop.eup %782  ;;  %v406_v9 = vsel %vm352_vm10, %v781_v3, 0.0 }
  0x44   : > { %v417_v12 = vsel %vm352_vm10, %v783_v5, 0.0  ;;  %v407_v21 = vadd.f32 %v406_v9, %v405_v6  ;;  %v461_v5 = vrot.slane %v460_v58, 1 }
  0x45   : > { %v418_v22 = vadd.f32 %v417_v12, %v416_v10 }
  0x46   : > { %v408_v26 = vrot.slane %v407_v21, 4  ;;  %v462_v17 = vadd.f32 %v461_v5, %v460_v58 }
  0x47   : > { %v419_v27 = vrot.slane %v418_v22, 4 }
  0x48   : > { %v409_v29 = vadd.f32 %v408_v26, %v407_v21 }
  0x49   : > { %v420_v30 = vadd.f32 %v419_v27, %v418_v22 }
  0x4a   : > { %v410_v32 = vrot.slane %v409_v29, 2 }
  0x4b   : > { %v421_v33 = vrot.slane %v420_v30, 2 }
  0x4c   : > { %v411_v36 = vadd.f32 %v410_v32, %v409_v29 }
  0x4d   : > { %v422_v37 = vadd.f32 %v421_v33, %v420_v30 }
  0x4e   : > { %v412_v38 = vrot.slane %v411_v36, 1 }
  0x4f   : > { %v423_v41 = vrot.slane %v422_v37, 1 }
  0x50   : > { %v413_v42 = vadd.f32 %v412_v38, %v411_v36 }
  0x51   : > { %v424_v45 = vadd.f32 %v423_v41, %v422_v37 }
  0x52   : > { %784 = vlog2.f32 %v413_v42 }
  0x53   : > { %786 = vlog2.f32 %v424_v45 }
  0x5c   : > { %v785_v60 = vpop.eup %784 }
  0x5d   : > { %v787_v1 = vpop.eup %786  ;;  %v426_v6 = vmul.f32 0.6931472, %v785_v60 }
  0x5e   : > { %v428_v9 = vmul.f32 0.6931472, %v787_v1 }
  0x5f   : > { %v429_v22 = vadd.f32 %v426_v6, %v1039_v39 }
  0x60   : > { %v430_v26 = vadd.f32 %v428_v9, %v1041_v40 }
  0x61   : > { %v520_v37 = vsub.f32 %v429_v22, %v451_v14 }
  0x62   : > { %v521_v38 = vsub.f32 %v430_v26, %v462_v17 }
  0x87   : > { %v476_v46 = vpop.permute.xlu1 %475  ;;  %v466_v47 = vpop.permute.xlu0 %465 }
  0x88   : > { %v488_v24 = vsel %vm340_vm2, %v466_v47, 0.0  ;;  %v489_v25 = vsel %vm341_vm3, %v466_v47, 0.0  ;;  %v492_v55 = vsel %vm344_vm0, %v476_v46, 0.0  ;;  %v493_v4 = vsel %vm345_vm1, %v476_v46, 0.0 }
  0x8b   : > { %v471_v52 = vpop.permute.xlu0 %470  ;;  %v481_v49 = vpop.permute.xlu1 %480 }
  0x8c   : > { %v490_v20 = vsel %vm342_vm6, %v471_v52, 0.0  ;;  %v491_v48 = vsel %vm343_vm7, %v471_v52, 0.0  ;;  %v494_v16 = vsel %vm346_vm4, %v481_v49, 0.0  ;;  %v495_v59 = vsel %vm347_vm5, %v481_v49, 0.0 }
  0x8d   : > { %v498_v54 = vadd.f32 %v490_v20, %v488_v24  ;;  %v509_v23 = vadd.f32 %v491_v48, %v489_v25 }
  0x8f   : > { %v499_v56 = vadd.f32 %v498_v54, %v492_v55  ;;  %v510_v28 = vadd.f32 %v509_v23, %v493_v4  ;;  %v486_v57 = vpop.permute.xlu0 %485 }
  0x90   : > { %v496_v34 = vsel %vm348_vm8, %v486_v57, 0.0  ;;  %v497_v11 = vsel %vm349_vm9, %v486_v57, 0.0 }
  0x91   : > { %v500_v61 = vadd.f32 %v499_v56, %v494_v16  ;;  %v501_v62 = vsel %vm352_vm10, %v496_v34, 0.0  ;;  %v511_v63 = vadd.f32 %v510_v28, %v495_v59  ;;  %v512_v35 = vsel %vm352_vm10, %v497_v11, 0.0 }
  0x93   : > { %v502_v2 = vadd.f32 %v501_v62, %v500_v61  ;;  %v513_v3 = vadd.f32 %v512_v35, %v511_v63 }
  0x95   : > { %v503_v13 = vrot.slane %v502_v2, 4  ;;  %v514_v10 = vrot.slane %v513_v3, 4 }
  0x97   : > { %v504_v12 = vadd.f32 %v503_v13, %v502_v2  ;;  %v515_v21 = vadd.f32 %v514_v10, %v513_v3 }
  0x99   : > { %v505_v27 = vrot.slane %v504_v12, 2  ;;  %v516_v29 = vrot.slane %v515_v21, 2 }
  0x9b   : > { %v506_v30 = vadd.f32 %v505_v27, %v504_v12  ;;  %v517_v32 = vadd.f32 %v516_v29, %v515_v21 }
  0x9d   : > { %v507_v33 = vrot.slane %v506_v30, 1  ;;  %v518_v36 = vrot.slane %v517_v32, 1 }
  0x9f   : > { %v508_v41 = vadd.f32 %v507_v33, %v506_v30  ;;  %v519_v42 = vadd.f32 %v518_v36, %v517_v32 }
  0xa1   : > { %v522_v43 = vmul.f32 %v520_v37, %v508_v41  ;;  %v523_v44 = vmul.f32 %v521_v38, %v519_v42 }
  0xa3   : > { %v526_v45 = vcombine.low %v522_v43, %v523_v44 }
  0xa5   : > { %v533_v46 = vrot.slane %v526_v45, %v1012_v53 }
  0xa7   : > { %v540_v47 = vrot.slane %v533_v46, %v1012_v53 }
  0xa9   : > { %v542_v39 = vsel %vm1029_vm13, %v540_v47, 0.0 }
  0xaa   : > { %v549_v40 = vrot.slane %v542_v39, %v878_v7  ;;  %v553_v50 = vrot.slane %v542_v39, %v881_v8 }
  0xac   : > { %v557_v51 = vsel %vm556_vm14, %v549_v40, 0.0  ;;  %v558_v52 = vsel %vm556_vm14, %v553_v50, 0.0 }
  0xad   : > { %v559_v18 = vadd.f32 %v558_v52, %v557_v51 }
  0xaf   : > { %560 = vadd.xlane.f32.xlu1 %v559_v18 }
  0xbc   : > { %v587_v19 = vpop.xlane.xlu0 %586 }
  0xbd   : > { %v588_v24 = vrot.slane %v587_v19, 4 }
  0xbf   : > { %v589_v25 = vadd.f32 %v588_v24, %v587_v19 }
  0xc1   : > { %v590_v20 = vrot.slane %v589_v25, 2 }
  0xc3   : > { %v591_v49 = vadd.f32 %v590_v20, %v589_v25 }
  0xc5   : > { %v592_v23 = vrot.slane %v591_v49, 1 }
  0xc7   : > { %v593_v4 = vadd.f32 %v592_v23, %v591_v49 }
 0x13c   : > { %v561_v53 = vpop.xlane.xlu1 %560 }
 0x13d   : > { %v562_v48 = vrot.slane %v561_v53, 4 }
 0x13f   : > { %v563_v0 = vadd.f32 %v562_v48, %v561_v53 }
 0x141   : > { %v564_v54 = vrot.slane %v563_v0, 2 }
 0x143   : > { %v565_v7 = vadd.f32 %v564_v54, %v563_v0 }
 0x145   : > { %v566_v8 = vrot.slane %v565_v7, 1 }
 0x147   : > { %v567_v55 = vadd.f32 %v566_v8, %v565_v7 }
 0x149   : > { %730 = vpush %v567_v55 }
 0x14a   : > { %732 = vpush %v593_v4 }
 0x17a   : > { %s731_s14 = spop %730 }
 0x17b   : > { %v569_v56 = vstv %s731_s14  ;;  %s733_s22 = spop %732 }
 0x17c   : > { %571 = vst.msk [vmem:[%s273_s13] sm:$0x1] %vm570_vm15, %v569_v56  ;;  %v595_v28 = vstv %s733_s22 }
 0x17d   : > { %596 = vst.msk [vmem:[%s279_s21] sm:$0x1] %vm570_vm15, %v595_v28 }
 0x17e PF: > { %s15_s17 = sadd.s32 1, %s810_s17   ;;  %s1135_s15 = smov %s806_s16 }
 0x17f   : > { %p12_p5 = scmp.ge.s32.totalorder %s15_s17, 4   ;;  %s1136_s16 = smov %s1138_s18 }
 0x181   :  { %14 = sbr.rel (!%p12_p5) target bundleno = 2 (0x2), region = 77 }

</bundles_post_ra>
